<compile_context>
chip_gen: v7x
topology: tpu7x:2x2x1
jax: 0.10.0
libtpu: 0.0.40
codegen_flags: <defaults>
</compile_context>

<pallas_src>
import jax
import jax.numpy as jnp
from jax.experimental import pallas as pl
from jax.experimental.pallas import tpu as pltpu


# ------------------------------------------------------------------ kernel ---
def _cembedding_kernel(x_ref, w1_ref, b1_ref, w2_ref, b2_ref, o_ref):
    """Fused 2-layer MLP tile. x_ref: (bb, D) f32; w*: bf16; b*: f32 (1, H)."""
    x = x_ref[...].astype(jnp.bfloat16)                              # in-kernel cast (no extra HBM pass)
    h = jnp.dot(x, w1_ref[...], preferred_element_type=jnp.float32)  # MXU, f32 acc
    h = h + b1_ref[...]                                              # folded Linear bias + eval-BN shift
    h = jnp.maximum(h, 0.1 * h)                                      # LeakyReLU(0.1)
    h = jnp.dot(h.astype(jnp.bfloat16), w2_ref[...],
                preferred_element_type=jnp.float32)
    h = h + b2_ref[...]
    h = jnp.maximum(h, 0.1 * h)
    o_ref[...] = h.astype(o_ref.dtype)


# ----------------------------------------------------------------- wrapper ---
def _round16(v):
    return max(16, (v // 16) * 16)


def _choose_block_b(batch, target=8192):
    """Largest multiple-of-16 tile <= target; shrink so the grid has >=4 steps
    when possible (>=2 steps per v7x TensorCore so DMA/compute/writeback can
    pipeline within a core; free on v5e/v6e single-core chips)."""
    bb = min(target, _round16(pl.cdiv(batch, 16) * 16))
    bb = _round16(bb)
    while bb > 16 and pl.cdiv(batch, bb) < 4:
        bb = _round16(bb // 2)
    return bb


def _lane_pad(n, lane=128):
    return ((n + lane - 1) // lane) * lane


def cembedding_forward(x, packed, *, block_b=None, target_block_b=8192,
                       out_dtype=jnp.bfloat16):
    """x: (B, 2*ncf) float32; packed: dict with block-diagonal folded params."""
    w1, b1, w2, b2 = packed["w1"], packed["b1"], packed["w2"], packed["b2"]
    B, D = x.shape
    assert w1.shape[0] == D
    hid = w1.shape[1]
    out_dim = w2.shape[1]

    bb = block_b if block_b is not None else _choose_block_b(B, target_block_b)
    grid_b = pl.cdiv(B, bb)

    # VMEM budget: double-buffered, lane-padded input & output tiles + resident params.
    x_item = jnp.dtype(x.dtype).itemsize
    o_item = jnp.dtype(out_dtype).itemsize
    tile_bytes = (2 * bb * _lane_pad(D) * x_item
                  + 2 * bb * _lane_pad(out_dim) * o_item)
    param_bytes = 2 * (w1.size * w1.dtype.itemsize + w2.size * w2.dtype.itemsize
                       + b1.size * b1.dtype.itemsize + b2.size * b2.dtype.itemsize)
    vmem_limit = int(min(48 * 2**20, max(tile_bytes + param_bytes + (4 << 20),
                                         16 * 2**20)))

    # Advisory cost estimate for XLA scheduling around this custom call.
    flops = 2 * B * (D * hid + w2.shape[0] * out_dim)
    bytes_accessed = (B * D * x_item + B * out_dim * o_item
                      + w1.size * w1.dtype.itemsize + w2.size * w2.dtype.itemsize
                      + b1.size * b1.dtype.itemsize + b2.size * b2.dtype.itemsize)
    cost = pl.CostEstimate(flops=flops, transcendentals=0,
                           bytes_accessed=bytes_accessed)

    out = pl.pallas_call(
        _cembedding_kernel,
        out_shape=jax.ShapeDtypeStruct((B, out_dim), out_dtype),  # no pad, no slice
        grid_spec=pltpu.PrefetchScalarGridSpec(
            num_scalar_prefetch=0,
            grid=(grid_b,),
            in_specs=[
                pl.BlockSpec((bb, D), lambda i: (i, 0)),          # x tile (ragged last tile OK)
                pl.BlockSpec(w1.shape, lambda i: (0, 0)),         # resident params
                pl.BlockSpec(b1.shape, lambda i: (0, 0)),
                pl.BlockSpec(w2.shape, lambda i: (0, 0)),
                pl.BlockSpec(b2.shape, lambda i: (0, 0)),
            ],
            out_specs=pl.BlockSpec((bb, out_dim), lambda i: (i, 0)),  # lane-dense (out_dim=128)
        ),
        compiler_params=pltpu.CompilerParams(
            dimension_semantics=("parallel",),
            vmem_limit_bytes=vmem_limit,
        ),
        cost_estimate=cost,
    )(x, w1, b1, w2, b2)
    return out


# -------------------------------------------------------- parameter set-up ---
def init_cembedding_params(key, n_continuous_features, out_channels):
    """Raw (un-folded) params mirroring the PyTorch module:
    2 DNNs x 2 layers of {Linear(W,b), BatchNorm1d(gamma,beta,mean,var,eps)}."""
    ncf = n_continuous_features // 2
    eps = 1e-5
    dnns = []
    for _ in range(2):  # embed1, embed2
        layers = []
        dims = [ncf, out_channels, out_channels]
        for i in range(2):
            fan_in, fan_out = dims[i], dims[i + 1]
            key, kw, kb, kg, kbt, km, kv = jax.random.split(key, 7)
            bound = 1.0 / (fan_in ** 0.5)
            layers.append(dict(
                w=jax.random.uniform(kw, (fan_in, fan_out), jnp.float32, -bound, bound),
                b=jax.random.uniform(kb, (fan_out,), jnp.float32, -bound, bound),
                gamma=jax.random.uniform(kg, (fan_out,), jnp.float32, 0.5, 1.5),
                beta=0.1 * jax.random.normal(kbt, (fan_out,), jnp.float32),
                mean=0.1 * jax.random.normal(km, (fan_out,), jnp.float32),
                var=jax.random.uniform(kv, (fan_out,), jnp.float32, 0.5, 1.5),
                eps=eps,
            ))
        dnns.append(layers)
    return dnns


def _fold_layer(layer):
    """Fold eval-mode BatchNorm into the preceding Linear (exact in f32)."""
    s = layer["gamma"] / jnp.sqrt(layer["var"] + layer["eps"])
    w = layer["w"] * s[None, :]
    b = (layer["b"] - layer["mean"]) * s + layer["beta"]
    return w, b


def _block_diag(a, b):
    m, n = a.shape
    p, q = b.shape
    top = jnp.concatenate([a, jnp.zeros((m, q), a.dtype)], axis=1)
    bot = jnp.concatenate([jnp.zeros((p, n), b.dtype), b], axis=1)
    return jnp.concatenate([top, bot], axis=0)


def fold_and_pack_params(dnns, param_dtype=jnp.bfloat16):
    """Merge the two DNN branches into block-diagonal weights so the kernel is
    a single 2-layer MLP over the full (B, 2*ncf) input. Exactly equivalent."""
    (l1a, l2a), (l1b, l2b) = dnns
    w1a, b1a = _fold_layer(l1a)
    w1b, b1b = _fold_layer(l1b)
    w2a, b2a = _fold_layer(l2a)
    w2b, b2b = _fold_layer(l2b)
    w1 = _block_diag(w1a, w1b)                       # (2*ncf, 2*C)
    w2 = _block_diag(w2a, w2b)                       # (2*C, 2*C)
    b1 = jnp.concatenate([b1a, b1b])[None, :]        # (1, 2*C) f32
    b2 = jnp.concatenate([b2a, b2b])[None, :]
    return dict(w1=w1.astype(param_dtype), b1=b1,
                w2=w2.astype(param_dtype), b2=b2)


# --------------------------------------------------------------- reference ---
def cembedding_ref(x, dnns):
    """Pure-JAX f32 reference faithful to the PyTorch forward (eval mode)."""
    ncf = x.shape[1] // 2

    def dnn(xh, layers):
        h = xh.astype(jnp.float32)
        for layer in layers:
            h = h @ layer["w"] + layer["b"]
            h = ((h - layer["mean"]) / jnp.sqrt(layer["var"] + layer["eps"])
                 * layer["gamma"] + layer["beta"])
            h = jnp.where(h > 0, h, 0.1 * h)   # LeakyReLU(0.1)
            # dropout_rate = 0 -> identity
        return h

    x1 = dnn(x[:, :ncf], dnns[0])
    x2 = dnn(x[:, ncf:2 * ncf], dnns[1])
    return jnp.concatenate([x1, x2], axis=-1)


# -------------------------------------------------------------------- main ---
if __name__ == "__main__":
    key = jax.random.PRNGKey(0)
    n_continuous_features = 32   # ncf = 16 per branch
    out_channels = 64            # concat output width = 128 -> lane-dense stores
    batch = 250                  # deliberately ragged: exercises unpadded last tile

    key, kx = jax.random.split(key)
    x = jax.random.normal(kx, (batch, n_continuous_features), jnp.float32)
    raw_params = init_cembedding_params(key, n_continuous_features, out_channels)
    packed = fold_and_pack_params(raw_params)

    out = cembedding_forward(x, packed)           # bf16 output by default
    out = jax.block_until_ready(out)

    ref = cembedding_ref(x, raw_params)
    assert out.shape == (batch, 2 * out_channels)
    diff = jnp.max(jnp.abs(out.astype(jnp.float32) - ref))
    assert jnp.allclose(out.astype(jnp.float32), ref, atol=5e-2, rtol=5e-2), float(diff)

    print("KERNEL_OK")
</pallas_src>

<mosaic_0001>
module attributes {stable_mosaic.version = 11 : i64} {
  func.func @_cembedding_kernel(%arg0: i32, %arg1: memref<64x32xf32, #tpu.memory_space<vmem>>, %arg2: memref<32x128xbf16, #tpu.memory_space<vmem>>, %arg3: memref<1x128xf32, #tpu.memory_space<vmem>>, %arg4: memref<128x128xbf16, #tpu.memory_space<vmem>>, %arg5: memref<1x128xf32, #tpu.memory_space<vmem>>, %arg6: memref<64x128xbf16, #tpu.memory_space<vmem>>) attributes {dimension_semantics = [#tpu.dimension_semantics<parallel>], iteration_bounds = array<i64: 4>, scalar_prefetch = 0 : i64, scratch_operands = 0 : i64, tpu.core_type = #tpu.core_type<tc>, window_params = [{transform_indices = @transform_0, window_bounds = array<i64: 64, 32>}, {pipeline_mode = #tpu.pipeline_mode<synchronous>, transform_indices = @transform_1, window_bounds = array<i64: 32, 128>}, {pipeline_mode = #tpu.pipeline_mode<synchronous>, transform_indices = @transform_2, window_bounds = array<i64: 1, 128>}, {pipeline_mode = #tpu.pipeline_mode<synchronous>, transform_indices = @transform_3, window_bounds = array<i64: 128, 128>}, {pipeline_mode = #tpu.pipeline_mode<synchronous>, transform_indices = @transform_4, window_bounds = array<i64: 1, 128>}, {transform_indices = @transform_5, window_bounds = array<i64: 64, 128>}]} {
    %c0 = arith.constant 0 : index
    %c0_0 = arith.constant 0 : index
    %0 = vector.load %arg1[%c0, %c0_0] : memref<64x32xf32, #tpu.memory_space<vmem>>, vector<64x32xf32>
    %1 = arith.truncf %0 : vector<64x32xf32> to vector<64x32xbf16>
    %c0_1 = arith.constant 0 : index
    %c0_2 = arith.constant 0 : index
    %2 = vector.load %arg2[%c0_1, %c0_2] : memref<32x128xbf16, #tpu.memory_space<vmem>>, vector<32x128xbf16>
    %cst = arith.constant dense<0.000000e+00> : vector<64x128xf32>
    %3 = tpu.matmul %1, %2, %cst {dimension_numbers = #tpu.dot_dimension_numbers<[1], [0], [0], [1], [0, 0, 1, 1], [], []>} : vector<64x32xbf16>, vector<32x128xbf16>, vector<64x128xf32> -> vector<64x128xf32>
    %c0_3 = arith.constant 0 : index
    %c0_4 = arith.constant 0 : index
    %4 = vector.load %arg3[%c0_3, %c0_4] : memref<1x128xf32, #tpu.memory_space<vmem>>, vector<1x128xf32>
    %5 = vector.broadcast %4 : vector<1x128xf32> to vector<64x128xf32>
    %6 = arith.addf %3, %5 : vector<64x128xf32>
    %cst_5 = arith.constant 1.000000e-01 : f32
    %7 = vector.broadcast %cst_5 : f32 to vector<64x128xf32>
    %8 = arith.mulf %7, %6 : vector<64x128xf32>
    %9 = arith.maximumf %6, %8 : vector<64x128xf32>
    %10 = arith.truncf %9 : vector<64x128xf32> to vector<64x128xbf16>
    %c0_6 = arith.constant 0 : index
    %c0_7 = arith.constant 0 : index
    %11 = vector.load %arg4[%c0_6, %c0_7] : memref<128x128xbf16, #tpu.memory_space<vmem>>, vector<128x128xbf16>
    %cst_8 = arith.constant dense<0.000000e+00> : vector<64x128xf32>
    %12 = tpu.matmul %10, %11, %cst_8 {dimension_numbers = #tpu.dot_dimension_numbers<[1], [0], [0], [1], [0, 0, 1, 1], [], []>} : vector<64x128xbf16>, vector<128x128xbf16>, vector<64x128xf32> -> vector<64x128xf32>
    %c0_9 = arith.constant 0 : index
    %c0_10 = arith.constant 0 : index
    %13 = vector.load %arg5[%c0_9, %c0_10] : memref<1x128xf32, #tpu.memory_space<vmem>>, vector<1x128xf32>
    %14 = vector.broadcast %13 : vector<1x128xf32> to vector<64x128xf32>
    %15 = arith.addf %12, %14 : vector<64x128xf32>
    %cst_11 = arith.constant 1.000000e-01 : f32
    %16 = vector.broadcast %cst_11 : f32 to vector<64x128xf32>
    %17 = arith.mulf %16, %15 : vector<64x128xf32>
    %18 = arith.maximumf %15, %17 : vector<64x128xf32>
    %19 = arith.truncf %18 : vector<64x128xf32> to vector<64x128xbf16>
    %c0_12 = arith.constant 0 : index
    %c0_13 = arith.constant 0 : index
    %20 = vector.load %arg6[%c0_12, %c0_13] : memref<64x128xbf16, #tpu.memory_space<vmem>>, vector<64x128xbf16>
    tpu.vector_store %arg6[%c0_12, %c0_13], %19 {strides = array<i32>} : memref<64x128xbf16, #tpu.memory_space<vmem>>, vector<64x128xbf16>,
    return
  }
  func.func @transform_0(%arg0: i32) -> (i32, i32) {
    %c0_i32 = arith.constant 0 : i32
    %c0_i32_0 = arith.constant 0 : i32
    return %arg0, %c0_i32 : i32, i32
  }
  func.func @transform_1(%arg0: i32) -> (i32, i32) {
    %c0_i32 = arith.constant 0 : i32
    %c0_i32_0 = arith.constant 0 : i32
    %c0_i32_1 = arith.constant 0 : i32
    return %c0_i32, %c0_i32_0 : i32, i32
  }
  func.func @transform_2(%arg0: i32) -> (i32, i32) {
    %c0_i32 = arith.constant 0 : i32
    %c0_i32_0 = arith.constant 0 : i32
    %c0_i32_1 = arith.constant 0 : i32
    return %c0_i32, %c0_i32_0 : i32, i32
  }
  func.func @transform_3(%arg0: i32) -> (i32, i32) {
    %c0_i32 = arith.constant 0 : i32
    %c0_i32_0 = arith.constant 0 : i32
    %c0_i32_1 = arith.constant 0 : i32
    return %c0_i32, %c0_i32_0 : i32, i32
  }
  func.func @transform_4(%arg0: i32) -> (i32, i32) {
    %c0_i32 = arith.constant 0 : i32
    %c0_i32_0 = arith.constant 0 : i32
    %c0_i32_1 = arith.constant 0 : i32
    return %c0_i32, %c0_i32_0 : i32, i32
  }
  func.func @transform_5(%arg0: i32) -> (i32, i32) {
    %c0_i32 = arith.constant 0 : i32
    %c0_i32_0 = arith.constant 0 : i32
    return %arg0, %c0_i32 : i32, i32
  }
}

</mosaic_0001>

<bundles_post_ra>
// kernel: tpu_custom_call.1
= control target key start
LH: loop header
LB: loop body
LE: loop exit
PB: predicated region body
PF: predicated region fallthrough
CT: control target
= control target key end

     0   :  { %10 = vsyncpa [#allocation3], 0  ;;  %s1044_s0 = inlined_call_operand.vmem [shape: f32[250,32], index: 0, kind: input, shape index: {}]   ;;  %s1045_s1 = inlined_call_operand.vmem [shape: bf16[32,128], index: 1, kind: input, shape index: {}]   ;;  %s1046_s2 = inlined_call_operand.vmem [shape: f32[1,128], index: 2, kind: input, shape index: {}]   ;;  %s1047_s3 = inlined_call_operand.vmem [shape: bf16[128,128], index: 3, kind: input, shape index: {}]   ;;  %s1048_s4 = inlined_call_operand.vmem [shape: f32[1,128], index: 4, kind: input, shape index: {}]   ;;  %s1049_s5 = inlined_call_operand.hbm [shape: bf16[250,128], index: 5, kind: output, shape index: {}]  }
   0x1   :  { %12 = vsyncpa [#allocation3 + $0x1], 0  ;;  %s898_s18 = smov 0   ;;  %s900_s19 = smov 0  }
   0x2   :  { %s902_s20 = smov 0   ;;  %s904_s21 = smov 0  }
   0x3 LB: > { %s919_s22 = sadd.s32 4294967295, %s863_s21   ;;  %s628_s23 = sadd.s32 4294967294, %s863_s21   ;;  %s863_s21 = sphi %s904_s21, %s1055_s21   ;;  %s859_s20 = sphi %s902_s20, %s1054_s20   ;;  %s855_s19 = sphi %s900_s19, %s1053_s19   ;;  %s851_s18 = sphi %s898_s18, %s1052_s18  }
   0x4   : > { %s923_s24 = sadd.s32 1, %s863_s21   ;;  %s135_s25 = sadd.s32 1, %s859_s20 }
   0x5   : > { %s132_s26 = ssub.s32 %s863_s21, %s923_s24  ;;  %p145_p0 = scmp.ne.s32.totalorder %s859_s20, %s855_s19 }
   0x6   : > { %p133_p1 = scmp.eq.s32.totalorder %s132_s26, 0  ;;  %p146_p2 = scmp.eq.s32.totalorder %s919_s22, 3 }
   0x7   : > { %p151_p3 = scmp.ne.s32.totalorder %s855_s19, %s851_s18  ;;  %p152_p4 = scmp.eq.s32.totalorder %s628_s23, 3 }
   0x8   : > { %s934_s27 = scalar_select %p133_p1, %s859_s20, %s135_s25  }
   0x9   : > { %p936_p5 = por %p146_p2, %p145_p0  ;;  %p940_p6 = por %p152_p4, %p151_p3 }
   0xa   : > { %p631_p7 = scmp.ge.s32.totalorder %s863_s21, 1  ;;  %p191_p8 = scmp.lt.s32.totalorder %s863_s21, 5 }
   0xc   : > { %p192_p9 = pnand %p631_p7, %p191_p8 }
   0xd   : > { %v791_v0 = vld [vmem:[%s1045_s1] sm:$0xff] (!%p192_p9)   ;;  %s633_s7 = sshll.u32 (!%p192_p9), %s919_s22, 3  ;;  %v792_v1 = vld [vmem:[%s1045_s1 + $0x8] sm:$0xff] (!%p192_p9)   ;;  %v795_v4 = vld [vmem:[%s1047_s3 + $0x10] sm:$0xff] (!%p192_p9)   ;;  %vm262_vm0 = vcmask (!%p192_p9), 261120   ;;  %s216_s23 = sand.u32 (!%p192_p9), 1, %s855_s19  }
   0xe   : > { %195 = sbr.rel (%p192_p9) target bundleno = 498 (0x1f2), region = 40  ;;  %p220_p10 = scmp.lt.s32.totalorder (!%p192_p9), %s633_s7, 31  ;;  %714 = vmatprep.subr.bf16.mxu0 (!%p192_p9), %v791_v0  ;;  %v793_v2 = vld [vmem:[%s1047_s3] sm:$0xff] (!%p192_p9)   ;;  %v794_v3 = vld [vmem:[%s1047_s3 + $0x8] sm:$0xff] (!%p192_p9)   ;;  %v796_v14 = vld [vmem:[%s1047_s3 + $0x18] sm:$0xff] (!%p192_p9)  }
   0xf   : > { %715 = vmatpush3.bf16.msra.mxu0 (!%p192_p9), %v791_v0  ;;  %726 = vmatprep.subr.bf16.mxu1 (!%p192_p9), %v793_v2  ;;  %v797_v17 = vld [vmem:[%s1047_s3 + $0x20] sm:$0xff] (!%p192_p9)   ;;  %v798_v19 = vld [vmem:[%s1047_s3 + $0x28] sm:$0xff] (!%p192_p9)   ;;  %v799_v20 = vld [vmem:[%s1047_s3 + $0x30] sm:$0xff] (!%p192_p9)   ;;  %s632_s25 = sshll.u32 (!%p192_p9), %s216_s23, 5  ;;  %s672_s6 = sshll.u32 (!%p192_p9), %s919_s22, 9 }
  0x10   : > { %716 = vmatprep.subr.bf16.mxu0 (!%p192_p9), %v792_v1  ;;  %727 = vmatpush3.bf16.msra.mxu1 (!%p192_p9), %v793_v2  ;;  %v800_v21 = vld [vmem:[%s1047_s3 + $0x38] sm:$0xff] (!%p192_p9)   ;;  %v635_v22 = vld [vmem:[%s1046_s2] ss:$0 sm:$0xff] (!%p192_p9)  ;;  %s218_s26 = scalar_lea.vmem (!%p192_p9), [#allocation2], %s632_s25  ;;  %s999_s9 = scalar_lea.hbm (!%p192_p9), %s1049_s5, %s672_s6 }
  0x11   : > { %728 = vmatprep.subr.bf16.mxu1 (!%p192_p9), %v794_v3  ;;  %v642_v59 = vld [vmem:[%s1048_s4] ss:$0 sm:$0xff] (!%p192_p9)  ;;  %s566_s30 = sshll.u32 (!%p192_p9), %s218_s26, 4  ;;  %s1003_s22 = scalar_lea.sflag (!%p192_p9), [#allocation3], %s216_s23  ;;  %s994_s30 = int_to_ptr.vmem [resolvable:$true] %s566_s30 }
  0x12   : > { %s801_s10 = scalar_lea.vmem (!%p192_p9), %s994_s30, 512  ;;  %s865_s11 = smov (!%p192_p9), [#allocation2]  }
  0x13   : > { %717 = vmatpush3.bf16.msra.mxu0 (!%p192_p9), %v792_v1  ;;  %p802_p11 = scmp.ne.s32.totalorder (!%p192_p9), %s994_s30, %s801_s10  ;;  %s805_s12 = sshll.u32 (!%p192_p9), %s865_s11, 4  ;;  %s806_s12 = int_to_ptr.vmem [resolvable:$false] %s805_s12 }
  0x14   : > { %729 = vmatpush3.bf16.msra.mxu1 (!%p192_p9), %v794_v3  ;;  %s807_s13 = scalar_lea.vmem (!%p192_p9), %s806_s12, 1024  ;;  %p808_p0 = scmp.lt.s32.totalorder (!%p192_p9), %s994_s30, %s806_s12 }
  0x15   : > { %s1057_s7 = smov (!%p220_p10, %s633_s7), 31  ;;  %730 = vmatprep.subr.bf16.mxu1 %v795_v4  ;;  %p803_p12 = pnand %p802_p11, %p936_p5 }
  0x16   : > { %s634_s14 = sshll.u32 %s1057_s7, 3  ;;  %p809_p1 = scmp.lt.s32.totalorder %s807_s13, %s801_s10 }
  0x17   : > { %s223_s17 = scalar_lea.vmem %s1044_s0, %s634_s14  ;;  %p804_p13 = pneg %p803_p12 }
  0x18   : > { %v227_v5 = vld [vmem:[%s223_s17] sm:$0xff]  ;;  %v228_v6 = vld [vmem:[%s223_s17 + $0x8] sm:$0xff]  ;;  %v229_v7 = vld [vmem:[%s223_s17 + $0x10] sm:$0xff]  ;;  %731 = vmatpush3.bf16.msra.mxu1 %v795_v4  ;;  %p810_p2 = por %p809_p1, %p808_p0 }
  0x19   : > { %v235_v8 = vpack.c.bf16 %v228_v6, %v227_v5  ;;  %v230_v9 = vld [vmem:[%s223_s17 + $0x18] sm:$0xff]  ;;  %v231_v10 = vld [vmem:[%s223_s17 + $0x20] sm:$0xff]  ;;  %v232_v11 = vld [vmem:[%s223_s17 + $0x28] sm:$0xff]  ;;  %732 = vmatprep.subr.bf16.mxu1 %v796_v14 }
  0x1a   : > { %v236_v12 = vpack.c.bf16 %v230_v9, %v229_v7  ;;  %v237_v13 = vpack.c.bf16 %v232_v11, %v231_v10  ;;  %v233_v15 = vld [vmem:[%s223_s17 + $0x30] sm:$0xff]  ;;  %v234_v16 = vld [vmem:[%s223_s17 + $0x38] sm:$0xff]  ;;  %p811_p3 = pnand %p810_p2, %p804_p13 }
  0x1b   : > { %718 = vmatprep.mubr.msk.bf16.mxu0 %vm262_vm0, %v235_v8  ;;  %v238_v18 = vpack.c.bf16 %v234_v16, %v233_v15 }
  0x1c   : > { %719 = vmatmul.mubr.msk.bf16.vlgmr.msra.gmra.mrb[0].mxu0 %vm262_vm0, %v236_v12  ;;  %733 = vmatpush3.bf16.msra.mxu1 %v796_v14 }
  0x1d   : > { %722 = vmatprep.mubr.msk.bf16.mxu0 %vm262_vm0, %v237_v13  ;;  %734 = vmatprep.subr.bf16.mxu1 %v797_v17 }
  0x20   : > { %735 = vmatpush3.bf16.msra.mxu1 %v797_v17 }
  0x21   : > { %736 = vmatprep.subr.bf16.mxu1 %v798_v19 }
  0x24   : > { %723 = vmatmul.mubr.msk.bf16.gmra.mrb[4].mxu0 %vm262_vm0, %v238_v18  ;;  %737 = vmatpush3.bf16.msra.mxu1 %v798_v19 }
  0x25   : > { %738 = vmatprep.subr.bf16.mxu1 %v799_v20 }
  0x28   : > { %739 = vmatpush3.bf16.msra.mxu1 %v799_v20 }
  0x29   : > { %740 = vmatprep.subr.bf16.mxu1 %v800_v21 }
  0x2c   : > { %741 = vmatpush3.bf16.msra.mxu1 %v800_v21 }
  0xef   : > { %v720_v23 = vpop.f32.mrb[0].mxu0 }
  0xf0   : > { %v318_v24 = vadd.f32 %v720_v23, %v635_v22  ;;  %v309_v25 = vpop.f32.mrb[1].mxu0 }
  0xf1   : > { %v310_v26 = vadd.f32 %v635_v22, %v309_v25  ;;  %v721_v27 = vpop.f32.mrb[2].mxu0 }
  0xf2   : > { %v342_v28 = vmul.f32 0.1, %v318_v24  ;;  %v321_v29 = vadd.f32 %v721_v27, %v635_v22  ;;  %v312_v30 = vpop.f32.mrb[3].mxu0 }
  0xf3   : > { %v340_v31 = vmul.f32 0.1, %v310_v26  ;;  %v313_v32 = vadd.f32 %v635_v22, %v312_v30 }
  0xf4   : > { %v343_v33 = vmul.f32 0.1, %v321_v29  ;;  %v350_v35 = vmax.f32 %v318_v24, %v342_v28 }
  0xf5   : > { %v341_v34 = vmul.f32 0.1, %v313_v32  ;;  %v348_v38 = vmax.f32 %v310_v26, %v340_v31 }
  0xf6   : > { %v351_v36 = vmax.f32 %v321_v29, %v343_v33 }
  0xf7   : > { %v724_v37 = vpop.f32.mrb[4].mxu0  ;;  %v349_v39 = vmax.f32 %v313_v32, %v341_v34 }
  0xf8   : > { %v334_v40 = vadd.f32 %v724_v37, %v635_v22  ;;  %v325_v41 = vpop.f32.mrb[5].mxu0  ;;  %v357_v42 = vpack.c.bf16 %v351_v36, %v350_v35 }
  0xf9   : > { %v326_v43 = vadd.f32 %v635_v22, %v325_v41  ;;  %v725_v44 = vpop.f32.mrb[6].mxu0  ;;  %v356_v45 = vpack.c.bf16 %v349_v39, %v348_v38 }
  0xfa   : > { %v346_v46 = vmul.f32 0.1, %v334_v40  ;;  %v337_v47 = vadd.f32 %v725_v44, %v635_v22  ;;  %v328_v48 = vpop.f32.mrb[7].mxu0 }
  0xfb   : > { %v344_v49 = vmul.f32 0.1, %v326_v43  ;;  %v329_v50 = vadd.f32 %v635_v22, %v328_v48  ;;  %742 = vmatprep.mubr.bf16.mxu1 %v356_v45 }
  0xfc   : > { %v347_v51 = vmul.f32 0.1, %v337_v47  ;;  %743 = vmatmul.mubr.bf16.vlgmr.msra.gmra.mrb[0].mxu1 %v357_v42  ;;  %v354_v53 = vmax.f32 %v334_v40, %v346_v46 }
  0xfd   : > { %v345_v52 = vmul.f32 0.1, %v329_v50  ;;  %v352_v55 = vmax.f32 %v326_v43, %v344_v49 }
  0xfe   : > { %v355_v54 = vmax.f32 %v337_v47, %v347_v51 }
  0xff   : > { %v353_v56 = vmax.f32 %v329_v50, %v345_v52 }
 0x100   : > { %v359_v57 = vpack.c.bf16 %v355_v54, %v354_v53 }
 0x101   : > { %v358_v58 = vpack.c.bf16 %v353_v56, %v352_v55 }
 0x103   : > { %746 = vmatprep.mubr.bf16.mxu1 %v358_v58 }
 0x104   : > { %747 = vmatmul.mubr.bf16.gmra.mrb[4].mxu1 %v359_v57 }
 0x1cf   : > { %v744_v60 = vpop.f32.mrb[0].mxu1 }
 0x1d0   : > { %v474_v61 = vadd.f32 %v744_v60, %v642_v59  ;;  %v465_v62 = vpop.f32.mrb[1].mxu1 }
 0x1d1   : > { %v466_v63 = vadd.f32 %v642_v59, %v465_v62  ;;  %v745_v0 = vpop.f32.mrb[2].mxu1 }
 0x1d2   : > { %v498_v1 = vmul.f32 0.1, %v474_v61  ;;  %v477_v2 = vadd.f32 %v745_v0, %v642_v59  ;;  %v468_v3 = vpop.f32.mrb[3].mxu1 }
 0x1d3   : > { %v496_v4 = vmul.f32 0.1, %v466_v63  ;;  %v469_v5 = vadd.f32 %v642_v59, %v468_v3 }
 0x1d4   : > { %v499_v6 = vmul.f32 0.1, %v477_v2  ;;  %v506_v8 = vmax.f32 %v474_v61, %v498_v1 }
 0x1d5   : > { %v497_v7 = vmul.f32 0.1, %v469_v5  ;;  %v504_v10 = vmax.f32 %v466_v63, %v496_v4 }
 0x1d6   : > { %v507_v9 = vmax.f32 %v477_v2, %v499_v6 }
 0x1d7   : > { %v505_v11 = vmax.f32 %v469_v5, %v497_v7  ;;  %v748_v12 = vpop.f32.mrb[4].mxu1 }
 0x1d8   : > { %v681_v13 = vpack.c.bf16 %v507_v9, %v506_v8  ;;  %v490_v14 = vadd.f32 %v748_v12, %v642_v59  ;;  %v481_v15 = vpop.f32.mrb[5].mxu1 }
 0x1d9   : > { %v676_v16 = vpack.c.bf16 %v505_v11, %v504_v10  ;;  %v482_v17 = vadd.f32 %v642_v59, %v481_v15  ;;  %v749_v18 = vpop.f32.mrb[6].mxu1 }
 0x1da   : > { %693 = vst [vmem:[%s218_s26 + $0x8] sm:$0xff] %v681_v13   ;;  %v502_v19 = vmul.f32 0.1, %v490_v14  ;;  %v493_v20 = vadd.f32 %v749_v18, %v642_v59  ;;  %v484_v21 = vpop.f32.mrb[7].mxu1 }
 0x1db   : > { %677 = vst [vmem:[%s218_s26] sm:$0xff] %v676_v16   ;;  %v500_v22 = vmul.f32 0.1, %v482_v17  ;;  %v485_v23 = vadd.f32 %v642_v59, %v484_v21 }
 0x1dc   : > { %v503_v24 = vmul.f32 0.1, %v493_v20  ;;  %v510_v26 = vmax.f32 %v490_v14, %v502_v19 }
 0x1dd   : > { %v501_v25 = vmul.f32 0.1, %v485_v23  ;;  %v508_v28 = vmax.f32 %v482_v17, %v500_v22 }
 0x1de   : > { %v511_v27 = vmax.f32 %v493_v20, %v503_v24 }
 0x1df   : > { %v509_v29 = vmax.f32 %v485_v23, %v501_v25 }
 0x1e0   : > { %v691_v30 = vpack.c.bf16 %v511_v27, %v510_v26 }
 0x1e1   : > { %v686_v31 = vpack.c.bf16 %v509_v29, %v508_v28 }
 0x1e2   : > { %695 = vst [vmem:[%s218_s26 + $0x18] sm:$0xff] %v691_v30  }
 0x1e3   : > { %694 = vst [vmem:[%s218_s26 + $0x10] sm:$0xff] %v686_v31  }
 0x1e4   : > { %814 = shalt.err (!%p811_p3)
}
 0x1e5   : > { %s815_s14 = scalar_lea.hbm %s999_s9, 512  ;;  %s819_s17 = scalar_lea.hbm %s1049_s5, 2048 }
 0x1e6   : > { %p816_p4 = scmp.ne.s32.totalorder %s999_s9, %s815_s14  ;;  %p820_p9 = scmp.lt.u32.totalorder %s999_s9, %s1049_s5 }
 0x1e7   : > { %p821_p10 = scmp.lt.u32.totalorder %s819_s17, %s815_s14  ;;  %p823_p12 = scmp.lt.u32.totalorder %s815_s14, %s999_s9 }
 0x1e8   : > { %p817_p7 = pnand %p816_p4, %p936_p5 }
 0x1e9   : > { %p822_p11 = por %p821_p10, %p820_p9 }
 0x1ea   : > { %p818_p8 = pneg %p817_p7 }
 0x1eb   : > { %p824_p13 = por %p823_p12, %p822_p11 }
 0x1ed   : > { %p825_p0 = pnand %p824_p13, %p818_p8 }
 0x1ef   : > { %828 = shalt.err (!%p825_p0)
}
 0x1f0   : > { %s866_s26 = smov 64   ;;  %s867_s6 = smov 4  }
 0x1f1   : > { %750 = dma.vmem_to_hbm [thread:$0]  (%p936_p5), %s994_s30, 512, %s999_s9, %s1003_s22, %s866_s26, %s866_s26, %s867_s6  }
 0x1f2 PF: > { %p756_p1 = scmp.ge.s32.totalorder %s863_s21, 2  ;;  %s581_s7 = sand.u32 1, %s851_s18  }
 0x1f3   : > { %s582_s8 = scalar_lea.sflag [#allocation3], %s581_s7 }
 0x1f4   : > { %p753_p2 = pnand %p756_p1, %p940_p6 }
 0x1f6   : > { %846 = dma.done.wait (!%p753_p2), %s582_s8, 512  }
 0x1f7   : > { %848 = vsyncadd (!%p753_p2), %s582_s8, 4294966784  ;;  %p15_p3 = scmp.ge.s32.totalorder %s923_s24, 6   ;;  %s1052_s18 = smov %s855_s19 }
 0x1f8   : > { %s1053_s19 = smov %s859_s20  ;;  %s1054_s20 = smov %s934_s27 }
 0x1f9   : > { %s1055_s21 = smov %s923_s24  ;;  %17 = sbr.rel (!%p15_p3) target bundleno = 3 (0x3), region = 75 }
 0x200   :  { %587 = vsyncpa [#allocation3], 1 }
 0x201   :  { %589 = vsyncpa [#allocation3 + $0x1], 1 }

</bundles_post_ra>
